<compile_context>
chip_gen: v6e
topology: v6e:2x2x1
jax: 0.10.0
libtpu: 0.0.40
codegen_flags: <defaults>
</compile_context>

<pallas_src>
import functools

import jax
import jax.numpy as jnp
from jax.experimental import pallas as pl
from jax.experimental.pallas import tpu as pltpu

LANES = 128


def _focal_loss_kernel(x_ref, t_ref, out_ref, *, gamma, n_valid, block_elems,
                       bpc):
    c = pl.program_id(0)   # core-split axis ("parallel")
    j = pl.program_id(1)   # reduction axis ("arbitrary")

    @pl.when(j == 0)
    def _():
        out_ref[...] = jnp.zeros_like(out_ref)

    # Compute in f32 regardless of storage dtype (v5e has no bf16 VALU/EUP).
    x = x_ref[...].astype(jnp.float32)
    t = t_ref[...].astype(jnp.float32)

    # Stable BCE-with-logits via the softplus identity:
    #   log(exp(-max_val) + exp(-x - max_val)) == log1p(exp(-|x|))
    #   x - x*t + max_val                      == max(x, 0) - x*t
    sp = jnp.log1p(jnp.exp(-jnp.abs(x)))
    bce = sp + jnp.maximum(x, 0.0) - x * t

    # invprobs = logsigmoid(-x*(2t-1)) = -softplus(x*(2t-1)), computed stably.
    # TODO(synk): for strictly {0,1} targets |z| == |x| and `sp` could be
    # reused here (5 -> 3 transcendentals/element); kept general so soft /
    # fractional targets match the PyTorch module exactly.
    z = x * (t * 2.0 - 1.0)
    invprobs = -(jnp.maximum(z, 0.0) + jnp.log1p(jnp.exp(-jnp.abs(z))))

    loss = jnp.exp(invprobs * gamma) * bce

    rows, lanes = loss.shape  # static

    def accumulate(v):
        # (rows,128) -> (8,128): pure vreg-wise VPU adds, no cross-lane work.
        out_ref[0] += v.reshape(rows // 8, 8, lanes).sum(axis=0)

    gb = c * bpc + j                                  # global block index
    needs_mask = (gb + 1) * block_elems > n_valid     # only the tail block(s)

    @pl.when(jnp.logical_not(needs_mask))
    def _():
        accumulate(loss)

    @pl.when(needs_mask)
    def _():
        # Only the (at most one per core) ragged / duplicated tail block pays
        # for the iota + select masking.  Must stay a select (not a multiply):
        # out-of-bounds lanes may hold NaN/Inf garbage.
        row = jax.lax.broadcasted_iota(jnp.int32, loss.shape, 0)
        col = jax.lax.broadcasted_iota(jnp.int32, loss.shape, 1)
        local = row * lanes + col
        limit = n_valid - gb * block_elems   # <= 0 for fully-duplicated blocks
        accumulate(jnp.where(local < limit, loss, 0.0))


def focal_loss(x, target, gamma, tile_rows=2048):
    assert x.shape == target.shape, (
        "Target size must be the same as input size")
    n_valid = int(x.size)
    assert 0 < n_valid < 2**31, "element count must fit in int32 index math"

    # Keep native storage dtype; cast to f32 inside the kernel only.
    xf = x.reshape(-1)
    tf = target.reshape(-1)

    # Pad only if the flat length is not a multiple of 8*128 (keeps every
    # block (8,128)-aligned).  Segmentation-sized inputs are powers of two,
    # so the common case is copy-free.
    granule = 8 * LANES
    padded_len = ((n_valid + granule - 1) // granule) * granule
    if padded_len != n_valid:
        xf = jnp.pad(xf, (0, padded_len - n_valid))
        tf = jnp.pad(tf, (0, padded_len - n_valid))

    rows = padded_len // LANES                 # multiple of 8
    x2 = xf.reshape(rows, LANES)
    t2 = tf.reshape(rows, LANES)

    tile = min(int(tile_rows), rows)
    tile = max((tile // 8) * 8, 8)             # multiple of 8
    block_elems = tile * LANES

    nb = pl.cdiv(rows, tile)                   # total row-blocks
    num_cores = 2 if nb >= 2 else 1            # v7x megacore split
    bpc = pl.cdiv(nb, num_cores)               # blocks per core

    def in_map(c, j):
        # Clamp so the (at most one) extra block on the last core re-reads a
        # valid block; its contribution is fully masked out in-kernel.
        return (jnp.minimum(c * bpc + j, nb - 1), 0)

    kernel = functools.partial(
        _focal_loss_kernel,
        gamma=float(gamma),
        n_valid=n_valid,
        block_elems=block_elems,
        bpc=bpc,
    )

    partials = pl.pallas_call(
        kernel,
        out_shape=jax.ShapeDtypeStruct((num_cores, 8, LANES), jnp.float32),
        grid_spec=pltpu.PrefetchScalarGridSpec(
            num_scalar_prefetch=0,
            grid=(num_cores, bpc),
            in_specs=[
                pl.BlockSpec((tile, LANES), in_map),
                pl.BlockSpec((tile, LANES), in_map),
            ],
            out_specs=pl.BlockSpec((1, 8, LANES), lambda c, j: (c, 0, 0)),
        ),
        compiler_params=pltpu.CompilerParams(
            dimension_semantics=("parallel", "arbitrary")),
    )(x2, t2)

    return jnp.sum(partials) / jnp.float32(n_valid)


def _focal_loss_ref(x, t, gamma):
    x = x.astype(jnp.float32)
    t = t.astype(jnp.float32)
    max_val = jnp.maximum(-x, 0.0)
    loss = (x - x * t + max_val
            + jnp.log(jnp.exp(-max_val) + jnp.exp(-x - max_val)))
    invprobs = jax.nn.log_sigmoid(-x * (t * 2.0 - 1.0))
    loss = jnp.exp(invprobs * gamma) * loss
    return jnp.mean(loss)


if __name__ == "__main__":
    key = jax.random.PRNGKey(0)
    kx, kt = jax.random.split(key)

    # NCHW logits and binary target mask, matching the segmentation use case.
    B, C, H, W = 2, 4, 16, 16
    x = jax.random.normal(kx, (B, C, H, W), dtype=jnp.float32) * 3.0
    target = (jax.random.uniform(kt, (B, C, H, W)) > 0.5).astype(jnp.float32)

    gamma = 2.0

    out = focal_loss(x, target, gamma)
    out = jax.block_until_ready(out)

    ref = _focal_loss_ref(x, target, gamma)
    assert jnp.allclose(out, ref, rtol=1e-5, atol=1e-6), (out, ref)

    print("KERNEL_OK")
</pallas_src>

<mosaic_0001>
module attributes {stable_mosaic.version = 11 : i64} {
  func.func @_focal_loss_kernel(%arg0: i32, %arg1: i32, %arg2: memref<16x128xf32, #tpu.memory_space<vmem>>, %arg3: memref<16x128xf32, #tpu.memory_space<vmem>>, %arg4: memref<1x8x128xf32, #tpu.memory_space<vmem>>) attributes {dimension_semantics = [#tpu.dimension_semantics<parallel>, #tpu.dimension_semantics<arbitrary>], iteration_bounds = array<i64: 1, 1>, scalar_prefetch = 0 : i64, scratch_operands = 0 : i64, tpu.core_type = #tpu.core_type<tc>, window_params = [{transform_indices = @transform_0, window_bounds = array<i64: 16, 128>}, {transform_indices = @transform_1, window_bounds = array<i64: 16, 128>}, {transform_indices = @transform_2, window_bounds = array<i64: 1, 8, 128>}]} {
    %c0_i32 = arith.constant 0 : i32
    %0 = arith.cmpi eq, %arg1, %c0_i32 : i32
    %1 = arith.extui %0 : i1 to i32
    %c0_i32_0 = arith.constant 0 : i32
    %2 = arith.cmpi ne, %1, %c0_i32_0 : i32
    scf.if %2 {
      %cst_15 = arith.constant 0.000000e+00 : f32
      %44 = vector.broadcast %cst_15 : f32 to vector<1x8x128xf32>
      %c0_16 = arith.constant 0 : index
      %c0_17 = arith.constant 0 : index
      %c0_18 = arith.constant 0 : index
      %45 = vector.load %arg4[%c0_16, %c0_17, %c0_18] : memref<1x8x128xf32, #tpu.memory_space<vmem>>, vector<1x8x128xf32>
      tpu.vector_store %arg4[%c0_16, %c0_17, %c0_18], %44 {strides = array<i32>} : memref<1x8x128xf32, #tpu.memory_space<vmem>>, vector<1x8x128xf32>,
    } else {
    }
    %c0 = arith.constant 0 : index
    %c0_1 = arith.constant 0 : index
    %3 = vector.load %arg2[%c0, %c0_1] : memref<16x128xf32, #tpu.memory_space<vmem>>, vector<16x128xf32>
    %c0_2 = arith.constant 0 : index
    %c0_3 = arith.constant 0 : index
    %4 = vector.load %arg3[%c0_2, %c0_3] : memref<16x128xf32, #tpu.memory_space<vmem>>, vector<16x128xf32>
    %5 = math.absf %3 : vector<16x128xf32>
    %cst = arith.constant 0.000000e+00 : f32
    %6 = vector.broadcast %cst : f32 to vector<16x128xf32>
    %7 = arith.subf %6, %5 : vector<16x128xf32>
    %8 = math.exp %7 : vector<16x128xf32>
    %9 = math.log1p %8 : vector<16x128xf32>
    %cst_4 = arith.constant 0.000000e+00 : f32
    %10 = vector.broadcast %cst_4 : f32 to vector<16x128xf32>
    %11 = arith.maximumf %3, %10 : vector<16x128xf32>
    %12 = arith.addf %9, %11 : vector<16x128xf32>
    %13 = arith.mulf %3, %4 : vector<16x128xf32>
    %14 = arith.subf %12, %13 : vector<16x128xf32>
    %cst_5 = arith.constant 2.000000e+00 : f32
    %15 = vector.broadcast %cst_5 : f32 to vector<16x128xf32>
    %16 = arith.mulf %4, %15 : vector<16x128xf32>
    %cst_6 = arith.constant 1.000000e+00 : f32
    %17 = vector.broadcast %cst_6 : f32 to vector<16x128xf32>
    %18 = arith.subf %16, %17 : vector<16x128xf32>
    %19 = arith.mulf %3, %18 : vector<16x128xf32>
    %cst_7 = arith.constant 0.000000e+00 : f32
    %20 = vector.broadcast %cst_7 : f32 to vector<16x128xf32>
    %21 = arith.maximumf %19, %20 : vector<16x128xf32>
    %22 = math.absf %19 : vector<16x128xf32>
    %cst_8 = arith.constant 0.000000e+00 : f32
    %23 = vector.broadcast %cst_8 : f32 to vector<16x128xf32>
    %24 = arith.subf %23, %22 : vector<16x128xf32>
    %25 = math.exp %24 : vector<16x128xf32>
    %26 = math.log1p %25 : vector<16x128xf32>
    %27 = arith.addf %21, %26 : vector<16x128xf32>
    %cst_9 = arith.constant 0.000000e+00 : f32
    %28 = vector.broadcast %cst_9 : f32 to vector<16x128xf32>
    %29 = arith.subf %28, %27 : vector<16x128xf32>
    %cst_10 = arith.constant 2.000000e+00 : f32
    %30 = vector.broadcast %cst_10 : f32 to vector<16x128xf32>
    %31 = arith.mulf %29, %30 : vector<16x128xf32>
    %32 = math.exp %31 : vector<16x128xf32>
    %33 = arith.mulf %32, %14 : vector<16x128xf32>
    %c1_i32 = arith.constant 1 : i32
    %34 = arith.muli %arg0, %c1_i32 : i32
    %35 = arith.addi %34, %arg1 : i32
    %c1_i32_11 = arith.constant 1 : i32
    %36 = arith.addi %35, %c1_i32_11 : i32
    %c2048_i32 = arith.constant 2048 : i32
    %37 = arith.muli %36, %c2048_i32 : i32
    %c2048_i32_12 = arith.constant 2048 : i32
    %38 = arith.cmpi sgt, %37, %c2048_i32_12 : i32
    %true = arith.constant true
    %39 = arith.xori %38, %true : i1
    %40 = arith.extui %39 : i1 to i32
    %c0_i32_13 = arith.constant 0 : i32
    %41 = arith.cmpi ne, %40, %c0_i32_13 : i32
    scf.if %41 {
      %c0_15 = arith.constant 0 : index
      %c0_16 = arith.constant 0 : index
      %c0_17 = arith.constant 0 : index
      %44 = vector.load %arg4[%c0_15, %c0_16, %c0_17] : memref<1x8x128xf32, #tpu.memory_space<vmem>>, vector<1x8x128xf32>
      %45 = vector.shape_cast %44 : vector<1x8x128xf32> to vector<8x128xf32>
      %46 = vector.shape_cast %33 : vector<16x128xf32> to vector<2x8x128xf32>
      %cst_18 = arith.constant dense<0.000000e+00> : vector<8x128xf32>
      %47 = vector.multi_reduction <add>, %46, %cst_18 [0] : vector<2x8x128xf32> to vector<8x128xf32>
      %48 = arith.addf %45, %47 : vector<8x128xf32>
      %c0_19 = arith.constant 0 : index
      %c0_20 = arith.constant 0 : index
      %c0_21 = arith.constant 0 : index
      %49 = vector.load %arg4[%c0_19, %c0_20, %c0_21] : memref<1x8x128xf32, #tpu.memory_space<vmem>>, vector<1x8x128xf32>
      %50 = vector.shape_cast %49 : vector<1x8x128xf32> to vector<8x128xf32>
      %51 = vector.shape_cast %48 : vector<8x128xf32> to vector<1x8x128xf32>
      tpu.vector_store %arg4[%c0_19, %c0_20, %c0_21], %51 {strides = array<i32>} : memref<1x8x128xf32, #tpu.memory_space<vmem>>, vector<1x8x128xf32>,
    } else {
    }
    %42 = arith.extui %38 : i1 to i32
    %c0_i32_14 = arith.constant 0 : i32
    %43 = arith.cmpi ne, %42, %c0_i32_14 : i32
    scf.if %43 {
      %44 = tpu.iota {dimensions = array<i32: 0>} : vector<16x128xi32>
      %45 = tpu.iota {dimensions = array<i32: 1>} : vector<16x128xi32>
      %c128_i32 = arith.constant 128 : i32
      %46 = vector.broadcast %c128_i32 : i32 to vector<16x128xi32>
      %47 = arith.muli %44, %46 : vector<16x128xi32>
      %48 = arith.addi %47, %45 : vector<16x128xi32>
      %c2048_i32_15 = arith.constant 2048 : i32
      %49 = arith.muli %35, %c2048_i32_15 : i32
      %c2048_i32_16 = arith.constant 2048 : i32
      %50 = arith.subi %c2048_i32_16, %49 : i32
      %51 = vector.broadcast %50 : i32 to vector<16x128xi32>
      %52 = arith.cmpi slt, %48, %51 : vector<16x128xi32>
      %cst_17 = arith.constant 0.000000e+00 : f32
      %53 = vector.broadcast %cst_17 : f32 to vector<16x128xf32>
      %54 = arith.select %52, %33, %53 : vector<16x128xi1>, vector<16x128xf32>
      %c0_18 = arith.constant 0 : index
      %c0_19 = arith.constant 0 : index
      %c0_20 = arith.constant 0 : index
      %55 = vector.load %arg4[%c0_18, %c0_19, %c0_20] : memref<1x8x128xf32, #tpu.memory_space<vmem>>, vector<1x8x128xf32>
      %56 = vector.shape_cast %55 : vector<1x8x128xf32> to vector<8x128xf32>
      %57 = vector.shape_cast %54 : vector<16x128xf32> to vector<2x8x128xf32>
      %cst_21 = arith.constant dense<0.000000e+00> : vector<8x128xf32>
      %58 = vector.multi_reduction <add>, %57, %cst_21 [0] : vector<2x8x128xf32> to vector<8x128xf32>
      %59 = arith.addf %56, %58 : vector<8x128xf32>
      %c0_22 = arith.constant 0 : index
      %c0_23 = arith.constant 0 : index
      %c0_24 = arith.constant 0 : index
      %60 = vector.load %arg4[%c0_22, %c0_23, %c0_24] : memref<1x8x128xf32, #tpu.memory_space<vmem>>, vector<1x8x128xf32>
      %61 = vector.shape_cast %60 : vector<1x8x128xf32> to vector<8x128xf32>
      %62 = vector.shape_cast %59 : vector<8x128xf32> to vector<1x8x128xf32>
      tpu.vector_store %arg4[%c0_22, %c0_23, %c0_24], %62 {strides = array<i32>} : memref<1x8x128xf32, #tpu.memory_space<vmem>>, vector<1x8x128xf32>,
    } else {
    }
    return
  }
  func.func @transform_0(%arg0: i32, %arg1: i32) -> (i32, i32) {
    %c1_i32 = arith.constant 1 : i32
    %0 = arith.muli %arg0, %c1_i32 : i32
    %1 = arith.addi %0, %arg1 : i32
    %c0_i32 = arith.constant 0 : i32
    %2 = arith.minsi %1, %c0_i32 : i32
    %c0_i32_0 = arith.constant 0 : i32
    %c0_i32_1 = arith.constant 0 : i32
    return %2, %c0_i32_0 : i32, i32
  }
  func.func @transform_1(%arg0: i32, %arg1: i32) -> (i32, i32) {
    %c1_i32 = arith.constant 1 : i32
    %0 = arith.muli %arg0, %c1_i32 : i32
    %1 = arith.addi %0, %arg1 : i32
    %c0_i32 = arith.constant 0 : i32
    %2 = arith.minsi %1, %c0_i32 : i32
    %c0_i32_0 = arith.constant 0 : i32
    %c0_i32_1 = arith.constant 0 : i32
    return %2, %c0_i32_0 : i32, i32
  }
  func.func @transform_2(%arg0: i32, %arg1: i32) -> (i32, i32, i32) {
    %c0_i32 = arith.constant 0 : i32
    %c0_i32_0 = arith.constant 0 : i32
    %c0_i32_1 = arith.constant 0 : i32
    return %arg0, %c0_i32, %c0_i32_0 : i32, i32, i32
  }
}

</mosaic_0001>

<bundles_post_ra>
// kernel: tpu_custom_call.1
= control target key start
LH: loop header
LB: loop body
LE: loop exit
PB: predicated region body
PF: predicated region fallthrough
CT: control target
= control target key end

     0   :  { %7 = vsyncpa [#allocation3], 0  ;;  %s347_s0 = inlined_call_operand.hbm [shape: f32[16,128], index: 0, kind: input, shape index: {}]   ;;  %s348_s1 = inlined_call_operand.hbm [shape: f32[16,128], index: 1, kind: input, shape index: {}]   ;;  %s349_s2 = inlined_call_operand.hbm [shape: f32[1,8,128], index: 2, kind: output, shape index: {}]  }
   0x1   :  { %8 = vsyncpa [#allocation6], 0 }
   0x2   :  { %9 = vsyncpa [#allocation4], 0  ;;  %s298_s9 = smov [#allocation2]  }
   0x3   :  { %s21_s10 = sshll.u32 %s298_s9, 4  ;;  %s22_s10 = int_to_ptr.vmem [resolvable:$true] %s21_s10 }
   0x4   :  { %s240_s11 = scalar_lea.vmem %s22_s10, 256  ;;  %p245_p1 = scmp.lt.s32.totalorder %s22_s10, %s22_s10 }
   0x5   :  { %p241_p0 = scmp.ne.s32.totalorder %s22_s10, %s240_s11  ;;  %p246_p2 = scmp.lt.s32.totalorder %s240_s11, %s240_s11 }
   0x7   :  { %p247_p3 = por %p246_p2, %p245_p1 }
   0x9   :  { %p248_p4 = pnand %p247_p3, %p241_p0 }
   0xb   :  { %251 = shalt.err (!%p248_p4)
}
   0xc   :  { %s299_s12 = smov 128   ;;  %s300_s13 = smov 8  }
   0xd   :  { %27 = dma.hbm_to_vmem [thread:$0]  %s347_s0, 256, %s22_s10, [#allocation3], %s299_s12, %s299_s12, %s300_s13  }
   0xe   :  { %s301_s16 = smov [#allocation5]  }
   0xf   :  { %s39_s17 = sshll.u32 %s301_s16, 4  ;;  %s40_s17 = int_to_ptr.vmem [resolvable:$true] %s39_s17 }
  0x10   :  { %s260_s18 = scalar_lea.vmem %s40_s17, 256  ;;  %p265_p6 = scmp.lt.s32.totalorder %s40_s17, %s40_s17 }
  0x11   :  { %p261_p5 = scmp.ne.s32.totalorder %s40_s17, %s260_s18  ;;  %p266_p7 = scmp.lt.s32.totalorder %s260_s18, %s260_s18 }
  0x13   :  { %p267_p8 = por %p266_p7, %p265_p6 }
  0x15   :  { %p268_p9 = pnand %p267_p8, %p261_p5 }
  0x17   :  { %271 = shalt.err (!%p268_p9)
}
  0x18   :  { %45 = dma.hbm_to_vmem [thread:$0]  %s348_s1, 256, %s40_s17, [#allocation6], %s299_s12, %s299_s12, %s300_s13  }
  0x19   :  { %292 = dma.done.wait [#allocation3], 256  }
  0x1a   :  { %293 = vsyncadd [#allocation3], 4294967040 }
  0x1b   :  { %294 = dma.done.wait [#allocation6], 256  }
  0x1c   :  { %295 = vsyncadd [#allocation6], 4294967040  ;;  %v324_v0 = vld [vmem:[#allocation5] sm:$0xff]  ;;  %v326_v1 = vld [vmem:[#allocation5 + $0x8] sm:$0xff]  ;;  %s302_s0 = smov [#allocation7]  }
  0x1d   :  { %v103_v2 = vmul.f32 2.0, %v324_v0  ;;  %v104_v3 = vmul.f32 2.0, %v326_v1  ;;  %v330_v4 = vld [vmem:[#allocation2] sm:$0xff]  ;;  %v332_v5 = vld [vmem:[#allocation2 + $0x8] sm:$0xff]  ;;  %s190_s1 = sshll.u32 %s302_s0, 4  ;;  %s191_s1 = int_to_ptr.vmem [resolvable:$true] %s190_s1 }
  0x1e   :  { %v69_v8 = vand.u32 2147483647, %v330_v4  ;;  %v70_v11 = vand.u32 2147483647, %v332_v5  ;;  %s272_s21 = scalar_lea.vmem %s191_s1, 128  ;;  %p277_p11 = scmp.lt.s32.totalorder %s191_s1, %s191_s1 }
  0x1f   :  { %v204_v6 = vadd.f32 -1.0, %v103_v2  ;;  %v205_v7 = vadd.f32 -1.0, %v104_v3  ;;  %p273_p10 = scmp.ne.s32.totalorder %s191_s1, %s272_s21  ;;  %p278_p12 = scmp.lt.s32.totalorder %s272_s21, %s272_s21 }
  0x20   :  { %v71_v14 = vsub.f32 0.0, %v69_v8  ;;  %v72_v16 = vsub.f32 0.0, %v70_v11  ;;  %v96_v8 = vmax.f32 %v332_v5, 0.0  ;;  %v99_v11 = vmul.f32 %v324_v0, %v330_v4 }
  0x21   :  { %v107_v9 = vmul.f32 %v204_v6, %v330_v4  ;;  %v108_v10 = vmul.f32 %v205_v7, %v332_v5  ;;  %v95_v6 = vmax.f32 %v330_v4, 0.0  ;;  %p279_p13 = por %p278_p12, %p277_p11 }
  0x22   :  { %v73_v20 = vmul.f32 1.442695, %v71_v14  ;;  %v75_v21 = vmul.f32 1.442695, %v72_v16 }
  0x23   :  { %v111_v12 = vand.u32 2147483647, %v107_v9  ;;  %v112_v13 = vand.u32 2147483647, %v108_v10  ;;  %v109_v38 = vmax.f32 %v107_v9, 0.0  ;;  %v110_v41 = vmax.f32 %v108_v10, 0.0  ;;  %p280_p0 = pnand %p279_p13, %p273_p10 }
  0x25   :  { %v113_v15 = vsub.f32 0.0, %v111_v12  ;;  %v114_v17 = vsub.f32 0.0, %v112_v13  ;;  %v100_v13 = vmul.f32 %v326_v1, %v332_v5 }
  0x27   :  { %v115_v18 = vmul.f32 1.442695, %v113_v15  ;;  %v117_v19 = vmul.f32 1.442695, %v114_v17 }
  0x29   :  { %212 = vpow2.f32 %v115_v18 }
  0x2a   :  { %214 = vpow2.f32 %v117_v19 }
  0x2b   :  { %216 = vpow2.f32 %v73_v20 }
  0x2c   :  { %218 = vpow2.f32 %v75_v21 }
  0x36   :  { %v213_v22 = vpop.eup %212 }
  0x37   :  { %v215_v23 = vpop.eup %214  ;;  %v119_v24 = vadd.f32 1.0, %v213_v22  ;;  %v122_v29 = vmul.f32 -0.5, %v213_v22  ;;  %v125_v33 = vand.u32 2147483647, %v213_v22 }
  0x38   :  { %v128_v25 = vadd.f32 1.0, %v215_v23  ;;  %v217_v26 = vpop.eup %216  ;;  %v131_v31 = vmul.f32 -0.5, %v215_v23  ;;  %v134_v35 = vand.u32 2147483647, %v215_v23 }
  0x39   :  { %220 = vlog2.f32 %v119_v24  ;;  %v219_v27 = vpop.eup %218  ;;  %v77_v28 = vadd.f32 1.0, %v217_v26  ;;  %v123_v32 = vadd.f32 1.0, %v122_v29  ;;  %vm126_vm0 = vcmp.lt.f32.partialorder %v125_v33, 0.0004427343 }
  0x3a   :  { %222 = vlog2.f32 %v128_v25  ;;  %v86_v30 = vadd.f32 1.0, %v219_v27  ;;  %v132_v34 = vadd.f32 1.0, %v131_v31  ;;  %vm135_vm1 = vcmp.lt.f32.partialorder %v134_v35, 0.0004427343 }
  0x3b   :  { %224 = vlog2.f32 %v77_v28  ;;  %v124_v36 = vmul.f32 %v213_v22, %v123_v32  ;;  %v80_v44 = vmul.f32 -0.5, %v217_v26  ;;  %v89_v46 = vmul.f32 -0.5, %v219_v27 }
  0x3c   :  { %226 = vlog2.f32 %v86_v30  ;;  %v133_v39 = vmul.f32 %v215_v23, %v132_v34  ;;  %v83_v54 = vand.u32 2147483647, %v217_v26  ;;  %v92_v58 = vand.u32 2147483647, %v219_v27 }
  0x3d   :  { %v81_v51 = vadd.f32 1.0, %v80_v44  ;;  %v90_v55 = vadd.f32 1.0, %v89_v46 }
  0x3e   :  { %vm84_vm2 = vcmp.lt.f32.partialorder %v83_v54, 0.0004427343  ;;  %vm93_vm3 = vcmp.lt.f32.partialorder %v92_v58, 0.0004427343 }
  0x3f   :  { %v82_v62 = vmul.f32 %v217_v26, %v81_v51  ;;  %v91_v3 = vmul.f32 %v219_v27, %v90_v55 }
  0x46   :  { %v221_v37 = vpop.eup %220 }
  0x47   :  { %v223_v40 = vpop.eup %222  ;;  %v121_v42 = vmul.f32 0.6931472, %v221_v37 }
  0x48   :  { %v130_v43 = vmul.f32 0.6931472, %v223_v40  ;;  %v225_v53 = vpop.eup %224 }
  0x49   :  { %v127_v45 = vsel %vm126_vm0, %v124_v36, %v121_v42  ;;  %v227_v57 = vpop.eup %226  ;;  %v79_v61 = vmul.f32 0.6931472, %v225_v53 }
  0x4a   :  { %v136_v47 = vsel %vm135_vm1, %v133_v39, %v130_v43  ;;  %v137_v48 = vadd.f32 %v127_v45, %v109_v38  ;;  %v88_v2 = vmul.f32 0.6931472, %v227_v57 }
  0x4b   :  { %v138_v49 = vadd.f32 %v136_v47, %v110_v41  ;;  %v85_v7 = vsel %vm84_vm2, %v82_v62, %v79_v61 }
  0x4c   :  { %v139_v50 = vsub.f32 0.0, %v137_v48  ;;  %v94_v9 = vsel %vm93_vm3, %v91_v3, %v88_v2  ;;  %v97_v10 = vadd.f32 %v95_v6, %v85_v7 }
  0x4d   :  { %v140_v52 = vsub.f32 0.0, %v138_v49  ;;  %v98_v12 = vadd.f32 %v96_v8, %v94_v9 }
  0x4e   :  { %v141_v56 = vmul.f32 2.0, %v139_v50  ;;  %v101_v14 = vsub.f32 %v97_v10, %v99_v11 }
  0x4f   :  { %v142_v59 = vmul.f32 2.0, %v140_v52  ;;  %v102_v15 = vsub.f32 %v98_v12, %v100_v13 }
  0x50   :  { %v143_v60 = vmul.f32 1.442695, %v141_v56 }
  0x51   :  { %v145_v63 = vmul.f32 1.442695, %v142_v59 }
  0x52   :  { %228 = vpow2.f32 %v143_v60 }
  0x53   :  { %230 = vpow2.f32 %v145_v63 }
  0x5f   :  { %v229_v16 = vpop.eup %228 }
  0x60   :  { %v231_v17 = vpop.eup %230  ;;  %v147_v18 = vmul.f32 %v229_v16, %v101_v14 }
  0x61   :  { %v148_v19 = vmul.f32 %v231_v17, %v102_v15 }
  0x63   :  { %v158_v20 = vadd.f32 %v148_v19, %v147_v18 }
  0x65   :  { %160 = vst [vmem:[#allocation7] sm:$0xff] %v158_v20 }
  0x66   :  { %283 = shalt.err (!%p280_p0)
}
  0x67   :  { %193 = dma.vmem_to_hbm [thread:$0]  %s191_s1, 128, %s349_s2, [#allocation4]  }
  0x68   :  { %296 = dma.done.wait [#allocation4], 128  }
  0x69   :  { %297 = vsyncadd [#allocation4], 4294967168 }
  0x6a   :  { %197 = vsyncpa [#allocation3], 1 }
  0x6b   :  { %198 = vsyncpa [#allocation6], 1 }
  0x6c   :  { %199 = vsyncpa [#allocation4], 1 }

</bundles_post_ra>
